<compile_context>
chip_gen: v7x
topology: tpu7x:2x2x1
jax: 0.10.0
libtpu: 0.0.40
codegen_flags: <defaults>
</compile_context>

<pallas_src>
import jax
import jax.numpy as jnp
from jax.experimental import pallas as pl
from jax.experimental.pallas import tpu as pltpu


# ---------------------------------------------------------------------------
# Kernels
# ---------------------------------------------------------------------------

def _linear_kernel_single(x_ref, w_ref, b_ref, o_ref):
    # Whole problem in one block: no accumulator, no grid reduction.
    # x_ref: [M, K], w_ref: [K, N] (MXU-native), b_ref: [1, N], o_ref: [M, N]
    acc = jnp.dot(x_ref[...], w_ref[...], preferred_element_type=jnp.float32)
    o_ref[...] = (acc + b_ref[...].astype(jnp.float32)).astype(o_ref.dtype)


def _linear_kernel_tiled(x_ref, w_ref, b_ref, o_ref, acc_ref):
    # x_ref:   [tm, tk]  activation tile
    # w_ref:   [tk, tn]  weight tile, already in [IN, OUT] layout (no transpose)
    # b_ref:   [1,  tn]  bias tile
    # o_ref:   [tm, tn]  output tile (resident across the k axis)
    # acc_ref: [tm, tn]  f32 accumulator (VMEM scratch)
    k = pl.program_id(2)

    @pl.when(k == 0)
    def _():
        acc_ref[...] = jnp.zeros_like(acc_ref)

    acc_ref[...] += jnp.dot(x_ref[...], w_ref[...],
                            preferred_element_type=jnp.float32)

    @pl.when(k == pl.num_programs(2) - 1)
    def _():
        o_ref[...] = (acc_ref[...]
                      + b_ref[...].astype(jnp.float32)).astype(o_ref.dtype)


# ---------------------------------------------------------------------------
# Helpers
# ---------------------------------------------------------------------------

def _round_up(v, m):
    return (v + m - 1) // m * m


def _sublane_multiple(dtype):
    # Minimum second-to-last-dim tile per dtype width.
    return {4: 8, 2: 16, 1: 32}.get(jnp.dtype(dtype).itemsize, 8)


def _vmem_cap_bytes():
    try:
        cap = getattr(pltpu.get_tpu_info(), "vmem_capacity_bytes", None)
        if cap:
            return int(cap)
    except Exception:
        pass
    return 64 * 1024 * 1024  # conservative: v7x per-TensorCore VMEM


def prepare_linear_weight(weight):
    """One-time layout change: PyTorch nn.Linear weight [OUT, IN] -> [IN, OUT].

    Do this once at parameter-creation time (outside the hot forward call)
    so the kernel never needs a transposed-RHS dot or a per-call weight.T.
    """
    return jnp.asarray(weight).T


# ---------------------------------------------------------------------------
# Wrapper
# ---------------------------------------------------------------------------

def linear_pallas(x, weight_t, bias, *, tm=512, tn=512, tk=1024):
    """y = x @ weight_t + bias  (== torch.nn.Linear forward).

    x:        [M, in_features]
    weight_t: [in_features, out_features]  (MXU-native; see prepare_linear_weight)
    bias:     [out_features]
    """
    M, K = x.shape
    K2, N = weight_t.shape
    assert K == K2, "weight/in_features mismatch"
    assert bias.shape == (N,), "bias shape mismatch"
    out_dtype = x.dtype
    itemsize = jnp.dtype(out_dtype).itemsize
    sub = _sublane_multiple(out_dtype)

    cost = pl.CostEstimate(
        flops=2 * M * K * N,
        transcendentals=0,
        bytes_accessed=x.nbytes + weight_t.nbytes + bias.nbytes
        + M * N * itemsize)

    # ---------------- Fast path: whole problem in one block -----------------
    # Blocks equal to the full array dims are tile-legal, so no padding, no
    # slice, no accumulator pass. This is the path the MoE shapes (8x32x16)
    # take, where wrapper-side pads/slices would dominate the matmul.
    fast_bytes = (M * K + K * N + N + M * N) * itemsize + M * N * 4
    if M <= tm and N <= tn and K <= tk and fast_bytes <= 16 * 1024 * 1024:
        return pl.pallas_call(
            _linear_kernel_single,
            out_shape=jax.ShapeDtypeStruct((M, N), out_dtype),
            grid_spec=pltpu.PrefetchScalarGridSpec(
                num_scalar_prefetch=0,
                grid=(1,),
                in_specs=[
                    pl.BlockSpec((M, K), lambda i: (0, 0)),
                    pl.BlockSpec((K, N), lambda i: (0, 0)),
                    pl.BlockSpec((1, N), lambda i: (0, 0)),
                ],
                out_specs=pl.BlockSpec((M, N), lambda i: (0, 0)),
            ),
            compiler_params=pltpu.CompilerParams(
                dimension_semantics=("arbitrary",)),
            cost_estimate=cost,
        )(x, weight_t, bias.reshape(1, N))

    # ---------------- General path: M/N/K-tiled with f32 accumulator --------
    # Dtype-aware sublane rounding for tm; lanes (tn, tk) always 128-aligned.
    tm = min(tm, _round_up(M, sub))
    tn = min(tn, _round_up(N, 128))
    tk = min(tk, _round_up(K, 128))

    Mp, Np, Kp = _round_up(M, tm), _round_up(N, tn), _round_up(K, tk)

    # Zero-pad only when needed (zeros along K are benign for the dot; padded
    # M rows / N cols are sliced off below).
    # NOTE: in the real MoE, pre-pad / pre-lay-out the weight once at param
    # creation so this per-call pad (a full extra HBM pass over W) never runs.
    xp = x if (Mp == M and Kp == K) else jnp.pad(x, ((0, Mp - M), (0, Kp - K)))
    wp = (weight_t if (Kp == K and Np == N)
          else jnp.pad(weight_t, ((0, Kp - K), (0, Np - N))))
    bp = (bias if Np == N else jnp.pad(bias, (0, Np - N))).reshape(1, Np)

    grid = (Mp // tm, Np // tn, Kp // tk)

    # Per-step VMEM: double-buffered input tiles + output buffers + resident
    # f32 accumulator, with 2x headroom; capped at 3/4 of physical VMEM so the
    # limit never exceeds the chip budget (48 MiB on v7x, 96 MiB on v5e/v6e).
    vmem_bytes = (2 * (tm * tk + tk * tn + tn) * itemsize
                  + 2 * tm * tn * itemsize
                  + tm * tn * 4)
    vmem_limit = int(min((_vmem_cap_bytes() * 3) // 4,
                         max(32 * 1024 * 1024, 2 * vmem_bytes)))

    out = pl.pallas_call(
        _linear_kernel_tiled,
        out_shape=jax.ShapeDtypeStruct((Mp, Np), out_dtype),
        grid_spec=pltpu.PrefetchScalarGridSpec(
            num_scalar_prefetch=0,
            grid=grid,
            in_specs=[
                pl.BlockSpec((tm, tk), lambda i, j, k: (i, k)),   # x tile
                pl.BlockSpec((tk, tn), lambda i, j, k: (k, j)),   # w tile [IN, OUT]
                pl.BlockSpec((1, tn), lambda i, j, k: (0, j)),    # bias tile
            ],
            out_specs=pl.BlockSpec((tm, tn), lambda i, j, k: (i, j)),
            scratch_shapes=[pltpu.VMEM((tm, tn), jnp.float32)],
        ),
        compiler_params=pltpu.CompilerParams(
            dimension_semantics=("parallel", "parallel", "arbitrary"),
            vmem_limit_bytes=vmem_limit),
        cost_estimate=cost,
    )(xp, wp, bp)

    # Slice off alignment padding (no-op when already aligned).
    return out[:M, :N]


# ---------------------------------------------------------------------------
# Self-test
# ---------------------------------------------------------------------------

if __name__ == "__main__":
    key = jax.random.PRNGKey(0)

    # ---- 1) MoE-sized problem (batch=8, in_features=32, out_features=16) ---
    B, IN, OUT = 8, 32, 16
    kx, kw, kb, kx2, kw2, kb2 = jax.random.split(key, 6)

    x = jax.random.normal(kx, (B, IN), dtype=jnp.float32)
    bound = 1.0 / (IN ** 0.5)
    weight = jax.random.uniform(kw, (OUT, IN), minval=-bound, maxval=bound,
                                dtype=jnp.float32)          # PyTorch layout
    bias = jax.random.uniform(kb, (OUT,), minval=-bound, maxval=bound,
                              dtype=jnp.float32)

    weight_t = prepare_linear_weight(weight)                 # one-time [IN, OUT]

    y = linear_pallas(x, weight_t, bias)
    jax.block_until_ready(y)

    y_ref = x @ weight.T + bias
    assert y.shape == (B, OUT)
    assert jnp.allclose(y, y_ref, atol=1e-5, rtol=1e-5), "small-shape mismatch"

    # ---- 2) Larger shape to exercise the tiled / padded general path -------
    M2, K2, N2 = 256, 2304, 384   # K forces a multi-step k loop + K padding
    x2 = jax.random.normal(kx2, (M2, K2), dtype=jnp.float32)
    w2 = jax.random.normal(kw2, (N2, K2), dtype=jnp.float32) * (1.0 / (K2 ** 0.5))
    b2 = jax.random.normal(kb2, (N2,), dtype=jnp.float32)

    y2 = linear_pallas(x2, prepare_linear_weight(w2), b2)
    jax.block_until_ready(y2)
    y2_ref = x2 @ w2.T + b2
    assert y2.shape == (M2, N2)
    # Looser tolerance: MXU pass count / accumulation order may differ from
    # the XLA reference dot for f32 operands.
    assert jnp.allclose(y2, y2_ref, atol=1e-2, rtol=1e-2), "tiled-path mismatch"

    print("KERNEL_OK")
</pallas_src>

<mosaic_0001>
module attributes {stable_mosaic.version = 11 : i64} {
  func.func @_linear_kernel_single(%arg0: i32, %arg1: memref<8x32xf32, #tpu.memory_space<vmem>>, %arg2: memref<32x16xf32, #tpu.memory_space<vmem>>, %arg3: memref<1x16xf32, #tpu.memory_space<vmem>>, %arg4: memref<8x16xf32, #tpu.memory_space<vmem>>) attributes {dimension_semantics = [#tpu.dimension_semantics<arbitrary>], iteration_bounds = array<i64: 1>, scalar_prefetch = 0 : i64, scratch_operands = 0 : i64, tpu.core_type = #tpu.core_type<tc>, window_params = [{pipeline_mode = #tpu.pipeline_mode<synchronous>, transform_indices = @transform_0, window_bounds = array<i64: 8, 32>}, {pipeline_mode = #tpu.pipeline_mode<synchronous>, transform_indices = @transform_1, window_bounds = array<i64: 32, 16>}, {pipeline_mode = #tpu.pipeline_mode<synchronous>, transform_indices = @transform_2, window_bounds = array<i64: 1, 16>}, {pipeline_mode = #tpu.pipeline_mode<synchronous>, transform_indices = @transform_3, window_bounds = array<i64: 8, 16>}]} {
    %c0 = arith.constant 0 : index
    %c0_0 = arith.constant 0 : index
    %0 = vector.load %arg1[%c0, %c0_0] : memref<8x32xf32, #tpu.memory_space<vmem>>, vector<8x32xf32>
    %c0_1 = arith.constant 0 : index
    %c0_2 = arith.constant 0 : index
    %1 = vector.load %arg2[%c0_1, %c0_2] : memref<32x16xf32, #tpu.memory_space<vmem>>, vector<32x16xf32>
    %cst = arith.constant dense<0.000000e+00> : vector<8x16xf32>
    %2 = tpu.matmul %0, %1, %cst {dimension_numbers = #tpu.dot_dimension_numbers<[1], [0], [0], [1], [0, 0, 1, 1], [], []>} : vector<8x32xf32>, vector<32x16xf32>, vector<8x16xf32> -> vector<8x16xf32>
    %c0_3 = arith.constant 0 : index
    %c0_4 = arith.constant 0 : index
    %3 = vector.load %arg3[%c0_3, %c0_4] : memref<1x16xf32, #tpu.memory_space<vmem>>, vector<1x16xf32>
    %4 = vector.broadcast %3 : vector<1x16xf32> to vector<8x16xf32>
    %5 = arith.addf %2, %4 : vector<8x16xf32>
    %c0_5 = arith.constant 0 : index
    %c0_6 = arith.constant 0 : index
    %6 = vector.load %arg4[%c0_5, %c0_6] : memref<8x16xf32, #tpu.memory_space<vmem>>, vector<8x16xf32>
    tpu.vector_store %arg4[%c0_5, %c0_6], %5 {strides = array<i32>} : memref<8x16xf32, #tpu.memory_space<vmem>>, vector<8x16xf32>,
    return
  }
  func.func @transform_0(%arg0: i32) -> (i32, i32) {
    %c0_i32 = arith.constant 0 : i32
    %c0_i32_0 = arith.constant 0 : i32
    %c0_i32_1 = arith.constant 0 : i32
    return %c0_i32, %c0_i32_0 : i32, i32
  }
  func.func @transform_1(%arg0: i32) -> (i32, i32) {
    %c0_i32 = arith.constant 0 : i32
    %c0_i32_0 = arith.constant 0 : i32
    %c0_i32_1 = arith.constant 0 : i32
    return %c0_i32, %c0_i32_0 : i32, i32
  }
  func.func @transform_2(%arg0: i32) -> (i32, i32) {
    %c0_i32 = arith.constant 0 : i32
    %c0_i32_0 = arith.constant 0 : i32
    %c0_i32_1 = arith.constant 0 : i32
    return %c0_i32, %c0_i32_0 : i32, i32
  }
  func.func @transform_3(%arg0: i32) -> (i32, i32) {
    %c0_i32 = arith.constant 0 : i32
    %c0_i32_0 = arith.constant 0 : i32
    %c0_i32_1 = arith.constant 0 : i32
    return %c0_i32, %c0_i32_0 : i32, i32
  }
}

</mosaic_0001>

<bundles_post_ra>
// kernel: tpu_custom_call.1
= control target key start
LH: loop header
LB: loop body
LE: loop exit
PB: predicated region body
PF: predicated region fallthrough
CT: control target
= control target key end

     0   :  { %v169_v3 = vmov 0.0|0.0   ;;  %vm170_vm0 = vmmov 0   ;;  %v171_v6 = vmov 0.0   ;;  %s223_s0 = inlined_call_operand.vmem [shape: f32[8,32], index: 0, kind: input, shape index: {}]   ;;  %s224_s1 = inlined_call_operand.vmem [shape: f32[32,16], index: 1, kind: input, shape index: {}]   ;;  %s225_s2 = inlined_call_operand.vmem [shape: f32[1,16], index: 2, kind: input, shape index: {}]   ;;  %s226_s3 = inlined_call_operand.hbm [shape: f32[8,16], index: 3, kind: output, shape index: {}]  }
   0x1   :  { %v16_v0 = vld [vmem:[%s224_s1] sm:$0xff]  ;;  %v17_v1 = vld [vmem:[%s224_s1 + $0x8] sm:$0xff]  ;;  %v18_v2 = vld [vmem:[%s224_s1 + $0x10] sm:$0xff]  ;;  %135 = vmatprep.subr.bf16.mxu0 %v169_v3  ;;  %132 = vmatprep.mubr.msk.f32.mxu0 %vm170_vm0, %v171_v6 }
   0x2   :  { %v136_v4 = vpack.c.bf16 %v17_v1, %v16_v0  ;;  %v19_v5 = vld [vmem:[%s224_s1 + $0x18] sm:$0xff] }
   0x3   :  { %8 = vsyncpa [#allocation3], 0  ;;  %v139_v7 = vpack.c.bf16 %v19_v5, %v18_v2  ;;  %v15_v8 = vld [vmem:[%s223_s0] sm:$0xff]  ;;  %vm27_vm1 = vcmask 261120   ;;  %s172_s24 = smov [#allocation2]   ;;  %vm101_vm2 = vcmask 130048  }
   0x4   :  { %137 = vmatpush3.bf16.msra.mxu0 %v136_v4  ;;  %v117_v9 = vld [vmem:[%s225_s2] ss:$0 sm:$0xff]  ;;  %s109_s1 = sshll.u32 %s172_s24, 4  ;;  %s110_s1 = int_to_ptr.vmem [resolvable:$true] %s109_s1 }
   0x5   :  { %138 = vmatprep.subr.bf16.mxu0 %v169_v3  ;;  %s145_s25 = scalar_lea.vmem %s110_s1, 128  ;;  %p150_p1 = scmp.lt.s32.totalorder %s110_s1, %s110_s1 }
   0x6   :  { %p146_p0 = scmp.ne.s32.totalorder %s110_s1, %s145_s25  ;;  %p151_p2 = scmp.lt.s32.totalorder %s145_s25, %s145_s25 }
   0x8   :  { %140 = vmatpush3.bf16.msra.mxu0 %v139_v7  ;;  %p152_p3 = por %p151_p2, %p150_p1 }
   0xa   :  { %p153_p4 = pnand %p152_p3, %p146_p0 }
   0xb   :  { %133 = vmatmul.mubr.msk.f32.vlgmr.msra.gmra.mrb[0].mxu0 %vm27_vm1, %v15_v8 }
  0xde   :  { %v97_v10 = vpop.f32.mrb[0].mxu0 }
  0xdf   :  { %v98_v11 = vadd.f32 %v117_v9, %v97_v10  ;;  %v134_v12 = vpop.f32.mrb[1].mxu0 }
  0xe1   :  { %102 = vst.msk [vmem:[#allocation2] sm:$0xff] %vm101_vm2, %v98_v11 }
  0xe2   :  { %156 = shalt.err (!%p153_p4)
}
  0xe3   :  { %s157_s27 = scalar_lea.hbm %s226_s3, 128 }
  0xe4   :  { %p158_p5 = scmp.ne.s32.totalorder %s226_s3, %s157_s27  ;;  %p161_p6 = scmp.lt.u32.totalorder %s157_s27, %s226_s3 }
  0xe6   :  { %p163_p7 = pnand %p161_p6, %p158_p5 }
  0xe8   :  { %166 = shalt.err (!%p163_p7)
}
  0xe9   :  { %112 = dma.vmem_to_hbm [thread:$0]  %s110_s1, 128, %s226_s3, [#allocation3]  }
  0xea   :  { %167 = dma.done.wait [#allocation3], 128  }
  0xeb   :  { %168 = vsyncadd [#allocation3], 4294967168 }
  0xec   :  { %116 = vsyncpa [#allocation3], 1 }

</bundles_post_ra>
